<compile_context>
chip_gen: v7x
topology: tpu7x:2x2x1
jax: 0.10.0
libtpu: 0.0.40
codegen_flags: <defaults>
</compile_context>

<pallas_src>
import jax
import jax.numpy as jnp
from jax.experimental import pallas as pl
from jax.experimental.pallas import tpu as pltpu


def _round_up(x: int, m: int) -> int:
    return (x + m - 1) // m * m


def _vmem_capacity_bytes() -> int:
    """Physical VMEM per TensorCore (generation-aware), with a safe fallback."""
    try:
        info = pltpu.get_tpu_info()
        cap = getattr(info, "vmem_capacity_bytes", None)
        if cap:
            return int(cap)
    except Exception:
        pass
    return 64 << 20  # conservative: v7x per-TC VMEM


def _pick_row_tile(M: int, target: int, sub: int) -> int:
    """Sublane-aligned row tile; prefers dividing M (no padding) and >=2 grid
    steps so both v7x TensorCores get work on the parallel M axis."""
    if M <= sub:
        return sub
    upper = min(_round_up(target, sub), _round_up(M, sub))
    if upper >= _round_up(M, sub):           # one tile would cover all of M
        upper = max(sub, _round_up((M + 1) // 2, sub))  # force >=2 steps
    for cand in range(upper, sub - 1, -sub):
        if M % cand == 0:
            return cand
    return upper


def _pick_inner_tile(Ip: int, target: int) -> int:
    """Largest multiple of 128 <= target that divides Ip (Ip is 128-aligned)."""
    target = min(Ip, max(128, _round_up(target, 128)))
    for cand in range(target, 127, -128):
        if Ip % cand == 0:
            return cand
    return 128


def clip_mlp_kernel(x_ref, w1_ref, b1_ref, w2_ref, b2_ref, o_ref, acc_ref):
    # x_ref:  (tm, Hp)   row-tile of flattened hidden_states
    # w1_ref: (Hp, tI)   fc1 weight chunk (pre-transposed)
    # b1_ref: (1,  tI)   fc1 bias chunk (f32)
    # w2_ref: (tI, Hp)   fc2 weight chunk (pre-transposed)
    # b2_ref: (1,  Hp)   fc2 bias (f32, grid-invariant)
    # o_ref:  (tm, Hp)   output row-tile
    # acc_ref:(tm, Hp)   f32 accumulator over I-chunks
    k = pl.program_id(1)

    @pl.when(k == 0)
    def _():
        acc_ref[...] = jnp.zeros_like(acc_ref)

    # fc1 chunk (MXU, f32 accumulation) + bias chunk
    h = jnp.dot(x_ref[...], w1_ref[...], preferred_element_type=jnp.float32)
    h = h + b1_ref[...]

    # QuickGELU: h * sigmoid(1.702 * h).  exp + approx reciprocal -> EUP slot,
    # kept in f32 (safe on v5e, hidden under MXU work on v6e/v7x).
    denom = 1.0 + jnp.exp(-1.702 * h)
    h = h * pl.reciprocal(denom, approx=True)

    # fc2 chunk, accumulated into the resident f32 accumulator.
    acc_ref[...] += jnp.dot(h.astype(w2_ref.dtype), w2_ref[...],
                            preferred_element_type=jnp.float32)

    @pl.when(k == pl.num_programs(1) - 1)
    def _():
        o_ref[...] = (acc_ref[...] + b2_ref[...]).astype(o_ref.dtype)


def prepare_clip_mlp_params(w1, b1, w2, b2, *, compute_dtype=jnp.bfloat16):
    """Cast + lane-pad weights/biases once (hoist out of the per-call path).

    w1: (H, I)  fc1.weight transposed,  b1: (I,)
    w2: (I, H)  fc2.weight transposed,  b2: (H,)
    """
    H, I = w1.shape
    assert w2.shape == (I, H) and b1.shape == (I,) and b2.shape == (H,)
    cd = jnp.dtype(compute_dtype)
    Hp, Ip = _round_up(H, 128), _round_up(I, 128)

    w1c = w1.astype(cd)
    w2c = w2.astype(cd)
    b1c = b1.reshape(1, I).astype(jnp.float32)
    b2c = b2.reshape(1, H).astype(jnp.float32)
    if (Hp, Ip) != (H, I):   # no-op for standard CLIP dims (already 128-aligned)
        w1c = jnp.pad(w1c, ((0, Hp - H), (0, Ip - I)))
        w2c = jnp.pad(w2c, ((0, Ip - I), (0, Hp - H)))
        b1c = jnp.pad(b1c, ((0, 0), (0, Ip - I)))
        b2c = jnp.pad(b2c, ((0, 0), (0, Hp - H)))
    return dict(w1=w1c, b1=b1c, w2=w2c, b2=b2c,
                hidden=H, intermediate=I, compute_dtype=cd)


def clip_mlp_prepared(x, params, *, out_dtype=None, tile_m=None, tile_i=None):
    H, I = params["hidden"], params["intermediate"]
    w1c, b1c, w2c, b2c = params["w1"], params["b1"], params["w2"], params["b2"]
    cd = params["compute_dtype"]
    Hp, Ip = w1c.shape
    assert x.shape[-1] == H

    lead = x.shape[:-1]
    M = 1
    for d in lead:
        M *= d
    od = jnp.dtype(out_dtype) if out_dtype is not None else jnp.dtype(x.dtype)

    cap = _vmem_capacity_bytes()
    budget = max(16 << 20, min(cap, 128 << 20) - (8 << 20))

    # Sublane granularity: 8 rows for 32-bit compute dtype, 16 for bf16.
    sub = 8 * max(1, 4 // cd.itemsize)
    tm_target = tile_m if tile_m is not None else (512 if cap >= (96 << 20) else 256)
    tm = _pick_row_tile(M, tm_target, sub)
    Mp = _round_up(M, tm)
    nm = Mp // tm

    def _est(tI, wbuf):
        w = wbuf * 2 * Hp * tI * cd.itemsize          # W1 + W2 chunks
        b = wbuf * tI * 4 + 2 * Hp * 4                # b1 chunk + b2
        io = 2 * tm * Hp * cd.itemsize + 2 * tm * Hp * od.itemsize
        acc = tm * Hp * 4
        live = 2 * tm * tI * 4                        # f32 intermediate + slack
        return w + b + io + acc + live

    if tile_i is None and _est(Ip, 1) <= int(budget * 0.8):
        tI = Ip                                        # weights fully resident
        wm = {"pipeline_mode": pl.Buffered(1)}         # grid-invariant -> 1 buffer
    else:
        tI = _pick_inner_tile(Ip, tile_i if tile_i is not None else 512)
        wm = {}                                        # chunks vary -> default 2 bufs
    nk = Ip // tI

    x2d = x.reshape(M, H).astype(cd)
    if (Mp, Hp) != (M, H):
        x2d = jnp.pad(x2d, ((0, Mp - M), (0, Hp - H)))

    vmem_est = _est(tI, 1 if wm else 2)
    vmem_limit = int(min(max(int(vmem_est * 1.3) + (2 << 20), 24 << 20), budget))

    cost = pl.CostEstimate(
        flops=int(4 * Mp * Hp * Ip),                   # two matmuls, 2*M*H*I each
        transcendentals=int(Mp * Ip),                  # one exp per intermediate elem
        bytes_accessed=int(Mp * Hp * (cd.itemsize + od.itemsize)
                           + nm * (2 * Hp * Ip * cd.itemsize + Ip * 4) + Hp * 4),
    )

    out = pl.pallas_call(
        clip_mlp_kernel,
        out_shape=jax.ShapeDtypeStruct((Mp, Hp), od),
        grid_spec=pltpu.PrefetchScalarGridSpec(
            num_scalar_prefetch=0,
            grid=(nm, nk),
            in_specs=[
                pl.BlockSpec((tm, Hp), lambda i, k: (i, 0)),          # x row-tile
                pl.BlockSpec((Hp, tI), lambda i, k: (0, k), **wm),    # W1 chunk
                pl.BlockSpec((1, tI), lambda i, k: (0, k), **wm),     # b1 chunk
                pl.BlockSpec((tI, Hp), lambda i, k: (k, 0), **wm),    # W2 chunk
                pl.BlockSpec((1, Hp), lambda i, k: (0, 0),
                             pipeline_mode=pl.Buffered(1)),           # b2 (invariant)
            ],
            out_specs=pl.BlockSpec((tm, Hp), lambda i, k: (i, 0)),
            scratch_shapes=[pltpu.VMEM((tm, Hp), jnp.float32)],       # f32 accumulator
        ),
        compiler_params=pltpu.CompilerParams(
            dimension_semantics=("parallel", "arbitrary"),   # M parallel, I reduction
            vmem_limit_bytes=vmem_limit,
        ),
        cost_estimate=cost,
    )(x2d, w1c, b1c, w2c, b2c)

    if (Mp, Hp) != (M, H):
        out = out[:M, :H]
    return out.reshape(*lead, H)


def clip_mlp(x, w1, b1, w2, b2, *, compute_dtype=jnp.bfloat16, out_dtype=None,
             tile_m=None, tile_i=None):
    """Convenience wrapper: prepares (casts/pads) params then runs the kernel.
    For repeated calls, call prepare_clip_mlp_params once and reuse it."""
    params = prepare_clip_mlp_params(w1, b1, w2, b2, compute_dtype=compute_dtype)
    return clip_mlp_prepared(x, params, out_dtype=out_dtype,
                             tile_m=tile_m, tile_i=tile_i)


def reference_clip_mlp(x, w1, b1, w2, b2):
    h = jnp.einsum("bsh,hi->bsi", x, w1) + b1
    h = h * jax.nn.sigmoid(1.702 * h)
    return jnp.einsum("bsi,ih->bsh", h, w2) + b2


if __name__ == "__main__":
    key = jax.random.PRNGKey(0)

    # ---- config 1: small CLIP-like (hidden=32, intermediate=128) ------------
    batch, seq, hidden, intermediate = 2, 8, 32, 128
    kx, k1, k2, k3, k4, key = jax.random.split(key, 6)
    x = jax.random.normal(kx, (batch, seq, hidden), dtype=jnp.float32)
    w1 = jax.random.normal(k1, (hidden, intermediate), dtype=jnp.float32) * 0.02
    b1 = jax.random.normal(k2, (intermediate,), dtype=jnp.float32) * 0.02
    w2 = jax.random.normal(k3, (intermediate, hidden), dtype=jnp.float32) * 0.02
    b2 = jax.random.normal(k4, (hidden,), dtype=jnp.float32) * 0.02

    ref = reference_clip_mlp(x, w1, b1, w2, b2)

    # f32 compute path (tight tolerance; only the EUP approx reciprocal deviates)
    out_f32 = jax.block_until_ready(
        clip_mlp(x, w1, b1, w2, b2, compute_dtype=jnp.float32))
    assert out_f32.shape == (batch, seq, hidden)
    err = float(jnp.max(jnp.abs(out_f32 - ref)))
    assert jnp.allclose(out_f32, ref, atol=2e-3, rtol=2e-3), f"f32 max abs err {err}"

    # default bf16 matmul operands, f32 accumulation (looser tolerance)
    out_bf = jax.block_until_ready(clip_mlp(x, w1, b1, w2, b2))
    err = float(jnp.max(jnp.abs(out_bf - ref)))
    assert jnp.allclose(out_bf, ref, atol=2e-2, rtol=2e-2), f"bf16 max abs err {err}"

    # ---- config 2: exercise the I-split accumulator path (nk=2, nm=2) -------
    hidden2, intermediate2 = 64, 256
    kx, k1, k2, k3, k4, key = jax.random.split(key, 6)
    x2 = jax.random.normal(kx, (batch, seq, hidden2), dtype=jnp.float32)
    w1_2 = jax.random.normal(k1, (hidden2, intermediate2), dtype=jnp.float32) * 0.02
    b1_2 = jax.random.normal(k2, (intermediate2,), dtype=jnp.float32) * 0.02
    w2_2 = jax.random.normal(k3, (intermediate2, hidden2), dtype=jnp.float32) * 0.02
    b2_2 = jax.random.normal(k4, (hidden2,), dtype=jnp.float32) * 0.02

    ref2 = reference_clip_mlp(x2, w1_2, b1_2, w2_2, b2_2)
    out2 = jax.block_until_ready(
        clip_mlp(x2, w1_2, b1_2, w2_2, b2_2,
                 compute_dtype=jnp.float32, tile_i=128))   # forces 2 I-chunks
    assert out2.shape == (batch, seq, hidden2)
    err = float(jnp.max(jnp.abs(out2 - ref2)))
    assert jnp.allclose(out2, ref2, atol=2e-3, rtol=2e-3), f"split max abs err {err}"

    print("KERNEL_OK")
</pallas_src>

<mosaic_0001>
module attributes {stable_mosaic.version = 11 : i64} {
  func.func @clip_mlp_kernel(%arg0: i32, %arg1: i32, %arg2: memref<8x128xf32, #tpu.memory_space<vmem>>, %arg3: memref<128x128xf32, #tpu.memory_space<vmem>>, %arg4: memref<1x128xf32, #tpu.memory_space<vmem>>, %arg5: memref<128x128xf32, #tpu.memory_space<vmem>>, %arg6: memref<1x128xf32, #tpu.memory_space<vmem>>, %arg7: memref<8x128xf32, #tpu.memory_space<vmem>>, %arg8: memref<8x128xf32, #tpu.memory_space<vmem>>) attributes {dimension_semantics = [#tpu.dimension_semantics<parallel>, #tpu.dimension_semantics<arbitrary>], iteration_bounds = array<i64: 2, 1>, scalar_prefetch = 0 : i64, scratch_operands = 1 : i64, tpu.core_type = #tpu.core_type<tc>, window_params = [{transform_indices = @transform_0, window_bounds = array<i64: 8, 128>}, {pipeline_mode = #tpu.pipeline_mode<synchronous>, transform_indices = @transform_1, window_bounds = array<i64: 128, 128>}, {pipeline_mode = #tpu.pipeline_mode<synchronous>, transform_indices = @transform_2, window_bounds = array<i64: 1, 128>}, {pipeline_mode = #tpu.pipeline_mode<synchronous>, transform_indices = @transform_3, window_bounds = array<i64: 128, 128>}, {pipeline_mode = #tpu.pipeline_mode<synchronous>, transform_indices = @transform_4, window_bounds = array<i64: 1, 128>}, {transform_indices = @transform_5, window_bounds = array<i64: 8, 128>}]} {
    %c0_i32 = arith.constant 0 : i32
    %0 = arith.cmpi eq, %arg1, %c0_i32 : i32
    %1 = arith.extui %0 : i1 to i32
    %c0_i32_0 = arith.constant 0 : i32
    %2 = arith.cmpi ne, %1, %c0_i32_0 : i32
    scf.if %2 {
      %cst_17 = arith.constant 0.000000e+00 : f32
      %24 = vector.broadcast %cst_17 : f32 to vector<8x128xf32>
      %c0_18 = arith.constant 0 : index
      %c0_19 = arith.constant 0 : index
      %25 = vector.load %arg8[%c0_18, %c0_19] : memref<8x128xf32, #tpu.memory_space<vmem>>, vector<8x128xf32>
      tpu.vector_store %arg8[%c0_18, %c0_19], %24 {strides = array<i32>} : memref<8x128xf32, #tpu.memory_space<vmem>>, vector<8x128xf32>,
    } else {
    }
    %c0 = arith.constant 0 : index
    %c0_1 = arith.constant 0 : index
    %3 = vector.load %arg2[%c0, %c0_1] : memref<8x128xf32, #tpu.memory_space<vmem>>, vector<8x128xf32>
    %c0_2 = arith.constant 0 : index
    %c0_3 = arith.constant 0 : index
    %4 = vector.load %arg3[%c0_2, %c0_3] : memref<128x128xf32, #tpu.memory_space<vmem>>, vector<128x128xf32>
    %cst = arith.constant dense<0.000000e+00> : vector<8x128xf32>
    %5 = tpu.matmul %3, %4, %cst {dimension_numbers = #tpu.dot_dimension_numbers<[1], [0], [0], [1], [0, 0, 1, 1], [], []>} : vector<8x128xf32>, vector<128x128xf32>, vector<8x128xf32> -> vector<8x128xf32>
    %c0_4 = arith.constant 0 : index
    %c0_5 = arith.constant 0 : index
    %6 = vector.load %arg4[%c0_4, %c0_5] : memref<1x128xf32, #tpu.memory_space<vmem>>, vector<1x128xf32>
    %7 = vector.broadcast %6 : vector<1x128xf32> to vector<8x128xf32>
    %8 = arith.addf %5, %7 : vector<8x128xf32>
    %cst_6 = arith.constant -1.702000e+00 : f32
    %9 = vector.broadcast %cst_6 : f32 to vector<8x128xf32>
    %10 = arith.mulf %9, %8 : vector<8x128xf32>
    %11 = math.exp %10 : vector<8x128xf32>
    %cst_7 = arith.constant 1.000000e+00 : f32
    %12 = vector.broadcast %cst_7 : f32 to vector<8x128xf32>
    %13 = arith.addf %12, %11 : vector<8x128xf32>
    %14 = tpu.reciprocal %13 {approx = true} : vector<8x128xf32> -> vector<8x128xf32>
    %15 = arith.mulf %8, %14 : vector<8x128xf32>
    %c0_8 = arith.constant 0 : index
    %c0_9 = arith.constant 0 : index
    %16 = vector.load %arg8[%c0_8, %c0_9] : memref<8x128xf32, #tpu.memory_space<vmem>>, vector<8x128xf32>
    %c0_10 = arith.constant 0 : index
    %c0_11 = arith.constant 0 : index
    %17 = vector.load %arg5[%c0_10, %c0_11] : memref<128x128xf32, #tpu.memory_space<vmem>>, vector<128x128xf32>
    %cst_12 = arith.constant dense<0.000000e+00> : vector<8x128xf32>
    %18 = tpu.matmul %15, %17, %cst_12 {dimension_numbers = #tpu.dot_dimension_numbers<[1], [0], [0], [1], [0, 0, 1, 1], [], []>} : vector<8x128xf32>, vector<128x128xf32>, vector<8x128xf32> -> vector<8x128xf32>
    %19 = arith.addf %16, %18 : vector<8x128xf32>
    %c0_13 = arith.constant 0 : index
    %c0_14 = arith.constant 0 : index
    %20 = vector.load %arg8[%c0_13, %c0_14] : memref<8x128xf32, #tpu.memory_space<vmem>>, vector<8x128xf32>
    tpu.vector_store %arg8[%c0_13, %c0_14], %19 {strides = array<i32>} : memref<8x128xf32, #tpu.memory_space<vmem>>, vector<8x128xf32>,
    %c0_i32_15 = arith.constant 0 : i32
    %21 = arith.cmpi eq, %arg1, %c0_i32_15 : i32
    %22 = arith.extui %21 : i1 to i32
    %c0_i32_16 = arith.constant 0 : i32
    %23 = arith.cmpi ne, %22, %c0_i32_16 : i32
    scf.if %23 {
      %c0_17 = arith.constant 0 : index
      %c0_18 = arith.constant 0 : index
      %24 = vector.load %arg8[%c0_17, %c0_18] : memref<8x128xf32, #tpu.memory_space<vmem>>, vector<8x128xf32>
      %c0_19 = arith.constant 0 : index
      %c0_20 = arith.constant 0 : index
      %25 = vector.load %arg6[%c0_19, %c0_20] : memref<1x128xf32, #tpu.memory_space<vmem>>, vector<1x128xf32>
      %26 = vector.broadcast %25 : vector<1x128xf32> to vector<8x128xf32>
      %27 = arith.addf %24, %26 : vector<8x128xf32>
      %c0_21 = arith.constant 0 : index
      %c0_22 = arith.constant 0 : index
      %28 = vector.load %arg7[%c0_21, %c0_22] : memref<8x128xf32, #tpu.memory_space<vmem>>, vector<8x128xf32>
      tpu.vector_store %arg7[%c0_21, %c0_22], %27 {strides = array<i32>} : memref<8x128xf32, #tpu.memory_space<vmem>>, vector<8x128xf32>,
    } else {
    }
    return
  }
  func.func @transform_0(%arg0: i32, %arg1: i32) -> (i32, i32) {
    %c0_i32 = arith.constant 0 : i32
    %c0_i32_0 = arith.constant 0 : i32
    return %arg0, %c0_i32 : i32, i32
  }
  func.func @transform_1(%arg0: i32, %arg1: i32) -> (i32, i32) {
    %c0_i32 = arith.constant 0 : i32
    %c0_i32_0 = arith.constant 0 : i32
    return %c0_i32, %arg1 : i32, i32
  }
  func.func @transform_2(%arg0: i32, %arg1: i32) -> (i32, i32) {
    %c0_i32 = arith.constant 0 : i32
    %c0_i32_0 = arith.constant 0 : i32
    return %c0_i32, %arg1 : i32, i32
  }
  func.func @transform_3(%arg0: i32, %arg1: i32) -> (i32, i32) {
    %c0_i32 = arith.constant 0 : i32
    %c0_i32_0 = arith.constant 0 : i32
    return %arg1, %c0_i32 : i32, i32
  }
  func.func @transform_4(%arg0: i32, %arg1: i32) -> (i32, i32) {
    %c0_i32 = arith.constant 0 : i32
    %c0_i32_0 = arith.constant 0 : i32
    %c0_i32_1 = arith.constant 0 : i32
    return %c0_i32, %c0_i32_0 : i32, i32
  }
  func.func @transform_5(%arg0: i32, %arg1: i32) -> (i32, i32) {
    %c0_i32 = arith.constant 0 : i32
    %c0_i32_0 = arith.constant 0 : i32
    return %arg0, %c0_i32 : i32, i32
  }
}

</mosaic_0001>

<bundles_post_ra>
// kernel: tpu_custom_call.1
= control target key start
LH: loop header
LB: loop body
LE: loop exit
PB: predicated region body
PF: predicated region fallthrough
CT: control target
= control target key end

     0   :  { %10 = vsyncpa [#allocation4], 0  ;;  %s1401_s0 = inlined_call_operand.hbm [shape: f32[16,128], index: 0, kind: input, shape index: {}]   ;;  %s1402_s1 = inlined_call_operand.hbm [shape: f32[128,128], index: 1, kind: input, shape index: {}]   ;;  %s1403_s2 = inlined_call_operand.vmem [shape: f32[1,128], index: 2, kind: input, shape index: {}]   ;;  %s1404_s3 = inlined_call_operand.hbm [shape: f32[128,128], index: 3, kind: input, shape index: {}]   ;;  %s1405_s4 = inlined_call_operand.vmem [shape: f32[1,128], index: 4, kind: input, shape index: {}]   ;;  %s1406_s5 = inlined_call_operand.hbm [shape: f32[16,128], index: 5, kind: output, shape index: {}]  }
   0x1   :  { %12 = vsyncpa [#allocation4 + $0x1], 0 }
   0x2   :  { %13 = vsyncpa [#allocation7], 0 }
   0x3   :  { %14 = vsyncpa [#allocation5], 0 }
   0x4   :  { %16 = vsyncpa [#allocation5 + $0x1], 0  ;;  %s1122_s18 = smov 0   ;;  %s1124_s19 = smov 0  }
   0x5   :  { %s1126_s20 = smov 0   ;;  %s1128_s21 = smov 0  }
   0x6   :  { %s1130_s22 = smov 0   ;;  %s1132_s23 = smov 0  }
   0x7 LB: > { %s645_s24 = sadd.s32 4294967295, %s1081_s23   ;;  %s646_s25 = sadd.s32 4294967294, %s1081_s23   ;;  %s1081_s23 = sphi %s1132_s23, %s22_s23   ;;  %s1077_s22 = sphi %s1130_s22, %s1428_s22   ;;  %s1073_s21 = sphi %s1128_s21, %s1427_s21   ;;  %s1069_s20 = sphi %s1126_s20, %s1426_s20   ;;  %s1065_s19 = sphi %s1124_s19, %s1425_s19   ;;  %s1061_s18 = sphi %s1122_s18, %s1424_s18  }
   0x8   : > { %p54_p0 = scmp.ne.s32.totalorder %s1065_s19, %s1061_s18  ;;  %p1156_p1 = scmp.eq.s32.totalorder %s645_s24, 0 }
   0x9   : > { %p1160_p2 = scmp.eq.s32.totalorder %s645_s24, 1  ;;  %p183_p3 = scmp.eq.s32.totalorder %s646_s25, 1 }
   0xa   : > { %s1411_s26 = scalar_select %p1156_p1, 1, 0 }
   0xb   : > { %p1166_p4 = por %p1156_p1, %p54_p0  ;;  %p647_p5 = scmp.ge.s32.totalorder %s1081_s23, 1 }
   0xc   : > { %p1171_p6 = por %p183_p3, %p54_p0  ;;  %p190_p7 = scmp.lt.s32.totalorder %s1081_s23, 3 }
   0xd   : > { %s1413_s28 = scalar_select %p1166_p4, 1, 0 }
   0xe   : > { %s1414_s29 = scalar_select %p1171_p6, 1, 0 }
   0xf   : > { %p1176_p8 = pnand %p647_p5, %p190_p7  ;;  %s1083_s6 = smov [#allocation6]  }
  0x10   : > { %s204_s7 = sshll.u32 %s1083_s6, 4  ;;  %s1084_s9 = smov [#allocation8]   ;;  %s1180_s7 = int_to_ptr.vmem [resolvable:$true] %s204_s7 }
  0x11   : > { %p829_p9 = pneg %p1176_p8  ;;  %s226_s10 = sshll.u32 %s1084_s9, 4  ;;  %s1191_s10 = int_to_ptr.vmem [resolvable:$true] %s226_s10 }
  0x12   : > { %s909_s13 = scalar_lea.hbm %s1402_s1, 2048 }
  0x13   : > { %p1187_p11 = pnand %p829_p9, %p1156_p1  ;;  %p910_p12 = scmp.ne.s32.totalorder %s1402_s1, %s909_s13 }
  0x14   : > { %p916_p5 = scmp.lt.u32.totalorder %s909_s13, %s1402_s1 }
  0x15   : > { %p911_p13 = pneg %p1187_p11 }
  0x17   : > { %p912_p0 = pnand %p911_p13, %p910_p12 }
  0x19   : > { %p913_p3 = pneg %p912_p0 }
  0x1b   : > { %p918_p7 = pnand %p916_p5, %p913_p3 }
  0x1d   : > { %921 = shalt.err (!%p918_p7)
}
  0x1e   : > { %s922_s24 = scalar_lea.vmem %s1180_s7, 2048  ;;  %p930_p1 = scmp.lt.s32.totalorder %s1180_s7, %s1180_s7 }
  0x1f   : > { %p923_p9 = scmp.ne.s32.totalorder %s1180_s7, %s922_s24  ;;  %p931_p12 = scmp.lt.s32.totalorder %s922_s24, %s922_s24 }
  0x21   : > { %p925_p10 = pnand %p923_p9, %p911_p13  ;;  %p932_p0 = por %p931_p12, %p930_p1 }
  0x23   : > { %p926_p6 = pneg %p925_p10 }
  0x25   : > { %p933_p4 = pnand %p932_p0, %p926_p6 }
  0x27   : > { %936 = shalt.err (!%p933_p4)
}
  0x28   : > { %s1085_s25 = smov 128   ;;  %s1086_s6 = smov 8  }
  0x29   : > { %832 = dma.hbm_to_vmem [thread:$0]  (!%p1187_p11), %s1402_s1, 2048, %s1180_s7, [#allocation7], %s1085_s25, %s1085_s25, %s1086_s6  }
  0x2a   : > { %s937_s14 = scalar_lea.hbm %s1404_s3, 2048 }
  0x2b   : > { %p938_p1 = scmp.ne.s32.totalorder %s1404_s3, %s937_s14  ;;  %p944_p10 = scmp.lt.u32.totalorder %s937_s14, %s1404_s3 }
  0x2d   : > { %p940_p4 = pnand %p938_p1, %p911_p13 }
  0x2f   : > { %p941_p6 = pneg %p940_p4 }
  0x31   : > { %p946_p3 = pnand %p944_p10, %p941_p6 }
  0x33   : > { %949 = shalt.err (!%p946_p3)
}
  0x34   : > { %s950_s7 = scalar_lea.vmem %s1191_s10, 2048  ;;  %p958_p12 = scmp.lt.s32.totalorder %s1191_s10, %s1191_s10 }
  0x35   : > { %p951_p5 = scmp.ne.s32.totalorder %s1191_s10, %s950_s7  ;;  %p959_p0 = scmp.lt.s32.totalorder %s950_s7, %s950_s7 }
  0x37   : > { %p953_p7 = pnand %p951_p5, %p911_p13  ;;  %p960_p1 = por %p959_p0, %p958_p12 }
  0x39   : > { %p954_p9 = pneg %p953_p7 }
  0x3b   : > { %p961_p4 = pnand %p960_p1, %p954_p9 }
  0x3d   : > { %964 = shalt.err (!%p961_p4)
}
  0x3e   : > { %835 = dma.hbm_to_vmem [thread:$0]  (!%p1187_p11), %s1404_s3, 2048, %s1191_s10, [#allocation7], %s1085_s25, %s1085_s25, %s1086_s6  }
  0x3f   : > { %s34_s12 = sadd.s32 1, %s1077_s22  ;;  %s41_s13 = sadd.s32 1, %s1069_s20 }
  0x40   : > { %p36_p13 = scmp.ge.s32.totalorder %s34_s12, 2  ;;  %p48_p6 = scmp.ne.s32.totalorder %s1069_s20, %s1065_s19 }
  0x41   : > { %p49_p10 = scmp.eq.s32.totalorder %s1081_s23, 0  ;;  %p846_p3 = scmp.lt.s32.totalorder %s1081_s23, 2 }
  0x42   : > { %s1430_s12 = smov (%p36_p13, %s34_s12), 0  ;;  %p1255_p7 = por %p1160_p2, %p48_p6 }
  0x43   : > { %p50_p5 = por %p49_p10, %p48_p6  ;;  %s38_s14 = ssub.s32 %s1077_s22, %s1430_s12 }
  0x44   : > { %s1417_s8 = scalar_select %p1255_p7, 1, 0 }
  0x45   : > { %s243_s15 = sand.u32 1, %s1069_s20   ;;  %p39_p9 = scmp.eq.s32.totalorder %s38_s14, 0 }
  0x46   : > { %s652_s10 = sshll.u32 %s243_s15, 3  ;;  %s653_s25 = sshll.u32 %s1077_s22, 7 }
  0x47   : > { %s1264_s6 = scalar_select %p39_p9, %s1069_s20, %s41_s13  }
  0x48   : > { %s1269_s24 = scalar_lea.hbm %s1401_s0, %s653_s25  ;;  %s247_s27 = scalar_lea.vmem [#allocation3], %s652_s10 }
  0x49   : > { %s254_s7 = sshll.u32 %s247_s27, 4  ;;  %p1273_p2 = pnand %p846_p3, %p50_p5  ;;  %s1277_s7 = int_to_ptr.vmem [resolvable:$true] %s254_s7 }
  0x4a   : > { %s244_s11 = scalar_lea.sflag [#allocation4], %s243_s15  ;;  %s965_s13 = scalar_lea.hbm %s1269_s24, 128 }
  0x4b   : > { %p966_p11 = scmp.ne.s32.totalorder %s1269_s24, %s965_s13  ;;  %p967_p12 = pneg %p1273_p2 }
  0x4c   : > { %s970_s25 = scalar_lea.hbm %s1401_s0, 256  ;;  %p971_p4 = scmp.lt.u32.totalorder %s1269_s24, %s1401_s0 }
  0x4d   : > { %p968_p0 = pnand %p967_p12, %p966_p11  ;;  %p972_p13 = scmp.lt.u32.totalorder %s970_s25, %s965_s13 }
  0x4e   : > { %p974_p10 = scmp.lt.u32.totalorder %s965_s13, %s1269_s24 }
  0x4f   : > { %p969_p1 = pneg %p968_p0  ;;  %p973_p6 = por %p972_p13, %p971_p4 }
  0x51   : > { %p975_p3 = por %p974_p10, %p973_p6 }
  0x53   : > { %p976_p5 = pnand %p975_p3, %p969_p1 }
  0x55   : > { %979 = shalt.err (!%p976_p5)
}
  0x56   : > { %s980_s15 = scalar_lea.vmem %s1277_s7, 128  ;;  %s1087_s27 = smov [#allocation3]  }
  0x57   : > { %p981_p9 = scmp.ne.s32.totalorder %s1277_s7, %s980_s15  ;;  %s985_s14 = sshll.u32 %s1087_s27, 4  ;;  %s986_s14 = int_to_ptr.vmem [resolvable:$false] %s985_s14 }
  0x58   : > { %s987_s10 = scalar_lea.vmem %s986_s14, 256  ;;  %p988_p7 = scmp.lt.s32.totalorder %s1277_s7, %s986_s14 }
  0x59   : > { %p983_p11 = pnand %p981_p9, %p967_p12  ;;  %p989_p4 = scmp.lt.s32.totalorder %s987_s10, %s980_s15 }
  0x5b   : > { %p984_p0 = pneg %p983_p11  ;;  %p990_p13 = por %p989_p4, %p988_p7 }
  0x5d   : > { %p991_p6 = pnand %p990_p13, %p984_p0 }
  0x5f   : > { %994 = shalt.err (!%p991_p6)
}
  0x60   : > { %839 = dma.hbm_to_vmem [thread:$0]  (!%p1273_p2), %s1269_s24, 128, %s1277_s7, %s244_s11  }
  0x61   : > { %263 = sbr.rel (%p1176_p8) target bundleno = 615 (0x267), region = 40  ;;  %s1307_s13 = sand.u32 (!%p1176_p8), 1, %s1065_s19  }
  0x62   : > { %s655_s25 = sshll.u32 (!%p1176_p8), %s1307_s13, 3  ;;  %s266_s16 = scalar_lea.sflag (!%p1176_p8), [#allocation4], %s1307_s13 }
  0x63   : > { %s1313_s17 = scalar_lea.vmem (!%p1176_p8), [#allocation3], %s655_s25  ;;  %p1419_p7 = scmp.ne.s32.totalorder (!%p1176_p8), %s1413_s28, 0 }
  0x68   : > { %1048 = dma.done.wait (%p1419_p7), %s266_s16, 128  }
  0x69   : > { %1050 = vsyncadd (%p1419_p7), %s266_s16, 4294967168  ;;  %p1420_p2 = scmp.ne.s32.totalorder %s1411_s26, 0 }
  0x6b   : > { %1052 = dma.done.wait (%p1420_p2), [#allocation7], 4096  }
  0x6c   : > { %1054 = vsyncadd (%p1420_p2), [#allocation7], 4294963200  ;;  %v1088_v0 = vmov 0.0|0.0   ;;  %vm1089_vm0 = vmmov 0   ;;  %v1090_v1 = vmov 0.0   ;;  %v317_v2 = vld [vmem:[#allocation6] sm:$0xff] }
  0x6d   : > { %769 = vmatprep.subr.bf16.mxu0 %v1088_v0  ;;  %731 = vmatprep.mubr.msk.f32.mxu0 %vm1089_vm0, %v1090_v1  ;;  %v318_v3 = vld [vmem:[#allocation6 + $0x8] sm:$0xff]  ;;  %v319_v4 = vld [vmem:[#allocation6 + $0x10] sm:$0xff]  ;;  %v320_v6 = vld [vmem:[#allocation6 + $0x18] sm:$0xff]  ;;  %s662_s7 = sshll.u32 %s1073_s21, 7  ;;  %s306_s9 = scalar_lea.vmem [#allocation9], %s655_s25 }
  0x6e   : > { %793 = vmatprep.subr.bf16.mxu1 %v1088_v0  ;;  %766 = vmatprep.mubr.msk.f32.mxu1 %vm1089_vm0, %v1090_v1  ;;  %v770_v5 = vpack.c.bf16 %v318_v3, %v317_v2  ;;  %v773_v7 = vpack.c.bf16 %v320_v6, %v319_v4  ;;  %v321_v8 = vld [vmem:[#allocation6 + $0x20] sm:$0xff]  ;;  %v322_v9 = vld [vmem:[#allocation6 + $0x28] sm:$0xff]  ;;  %v323_v11 = vld [vmem:[#allocation6 + $0x30] sm:$0xff]  ;;  %s532_s11 = sshll.u32 %s306_s9, 4  ;;  %s1352_s14 = scalar_lea.hbm %s1406_s5, %s662_s7  ;;  %s1354_s11 = int_to_ptr.vmem [resolvable:$true] %s532_s11 }
  0x6f   : > { %v776_v10 = vpack.c.bf16 %v322_v9, %v321_v8  ;;  %v324_v12 = vld [vmem:[#allocation6 + $0x38] sm:$0xff]  ;;  %v325_v14 = vld [vmem:[#allocation6 + $0x40] sm:$0xff]  ;;  %v326_v15 = vld [vmem:[#allocation6 + $0x48] sm:$0xff]  ;;  %s519_s10 = scalar_lea.sflag [#allocation5], %s1307_s13  ;;  %s995_s16 = scalar_lea.vmem %s1354_s11, 128 }
  0x70   : > { %771 = vmatpush3.bf16.msra.mxu0 %v770_v5  ;;  %v779_v13 = vpack.c.bf16 %v324_v12, %v323_v11  ;;  %v782_v16 = vpack.c.bf16 %v326_v15, %v325_v14  ;;  %v327_v17 = vld [vmem:[#allocation6 + $0x50] sm:$0xff]  ;;  %v328_v18 = vld [vmem:[#allocation6 + $0x58] sm:$0xff]  ;;  %v329_v20 = vld [vmem:[#allocation6 + $0x60] sm:$0xff]  ;;  %p996_p8 = scmp.ne.s32.totalorder %s1354_s11, %s995_s16  ;;  %p1421_p12 = scmp.ne.s32.totalorder %s1417_s8, 0 }
  0x71   : > { %772 = vmatprep.subr.bf16.mxu0 %v1088_v0  ;;  %v785_v19 = vpack.c.bf16 %v328_v18, %v327_v17  ;;  %v330_v21 = vld [vmem:[#allocation6 + $0x68] sm:$0xff]  ;;  %v331_v23 = vld [vmem:[#allocation6 + $0x70] sm:$0xff]  ;;  %v332_v24 = vld [vmem:[#allocation6 + $0x78] sm:$0xff]  ;;  %s1091_s21 = smov [#allocation9]  }
  0x72   : > { %v788_v22 = vpack.c.bf16 %v330_v21, %v329_v20  ;;  %v791_v25 = vpack.c.bf16 %v332_v24, %v331_v23  ;;  %v316_v26 = vld [vmem:[%s1313_s17] sm:$0xff]  ;;  %v417_v27 = vld [vmem:[#allocation8] sm:$0xff]  ;;  %v418_v28 = vld [vmem:[#allocation8 + $0x8] sm:$0xff]  ;;  %p997_p1 = pnand %p996_p8, %p1421_p12  ;;  %s999_s25 = sshll.u32 %s1091_s21, 4  ;;  %s1000_s25 = int_to_ptr.vmem [resolvable:$false] %s999_s25 }
  0x73   : > { %v794_v29 = vpack.c.bf16 %v418_v28, %v417_v27  ;;  %v419_v30 = vld [vmem:[#allocation8 + $0x10] sm:$0xff]  ;;  %v420_v31 = vld [vmem:[#allocation8 + $0x18] sm:$0xff]  ;;  %v421_v33 = vld [vmem:[#allocation8 + $0x20] sm:$0xff]  ;;  %s1001_s17 = scalar_lea.vmem %s1000_s25, 256  ;;  %p1002_p3 = scmp.lt.s32.totalorder %s1354_s11, %s1000_s25 }
  0x74   : > { %774 = vmatpush3.bf16.msra.mxu0 %v773_v7  ;;  %v797_v32 = vpack.c.bf16 %v420_v31, %v419_v30  ;;  %v422_v34 = vld [vmem:[#allocation8 + $0x28] sm:$0xff]  ;;  %v423_v36 = vld [vmem:[#allocation8 + $0x30] sm:$0xff]  ;;  %v424_v37 = vld [vmem:[#allocation8 + $0x38] sm:$0xff]  ;;  %p998_p10 = pneg %p997_p1  ;;  %p1003_p5 = scmp.lt.s32.totalorder %s1001_s17, %s995_s16 }
  0x75   : > { %775 = vmatprep.subr.bf16.mxu0 %v1088_v0  ;;  %795 = vmatpush3.bf16.msra.mxu1 %v794_v29  ;;  %v800_v35 = vpack.c.bf16 %v422_v34, %v421_v33  ;;  %v803_v38 = vpack.c.bf16 %v424_v37, %v423_v36  ;;  %v425_v39 = vld [vmem:[#allocation8 + $0x40] sm:$0xff]  ;;  %v426_v40 = vld [vmem:[#allocation8 + $0x48] sm:$0xff]  ;;  %v427_v42 = vld [vmem:[#allocation8 + $0x50] sm:$0xff] }
  0x76   : > { %796 = vmatprep.subr.bf16.mxu1 %v1088_v0  ;;  %v806_v41 = vpack.c.bf16 %v426_v40, %v425_v39  ;;  %v428_v43 = vld [vmem:[#allocation8 + $0x58] sm:$0xff]  ;;  %v429_v45 = vld [vmem:[#allocation8 + $0x60] sm:$0xff]  ;;  %v430_v46 = vld [vmem:[#allocation8 + $0x68] sm:$0xff]  ;;  %p1004_p9 = por %p1003_p5, %p1002_p3 }
  0x77   : > { %v809_v44 = vpack.c.bf16 %v428_v43, %v427_v42  ;;  %v812_v47 = vpack.c.bf16 %v430_v46, %v429_v45  ;;  %v431_v48 = vld [vmem:[#allocation8 + $0x70] sm:$0xff]  ;;  %v432_v49 = vld [vmem:[#allocation8 + $0x78] sm:$0xff] }
  0x78   : > { %777 = vmatpush3.bf16.msra.mxu0 %v776_v10  ;;  %v815_v50 = vpack.c.bf16 %v432_v49, %v431_v48  ;;  %v659_v51 = vld [vmem:[%s1403_s2] ss:$0 sm:$0xff]  ;;  %p1005_p11 = pnand %p1004_p9, %p998_p10 }
  0x79   : > { %778 = vmatprep.subr.bf16.mxu0 %v1088_v0  ;;  %798 = vmatpush3.bf16.msra.mxu1 %v797_v32  ;;  %v660_v61 = vld [vmem:[%s1405_s4] ss:$0 sm:$0xff] }
  0x7a   : > { %799 = vmatprep.subr.bf16.mxu1 %v1088_v0 }
  0x7c   : > { %780 = vmatpush3.bf16.msra.mxu0 %v779_v13 }
  0x7d   : > { %781 = vmatprep.subr.bf16.mxu0 %v1088_v0  ;;  %801 = vmatpush3.bf16.msra.mxu1 %v800_v35 }
  0x7e   : > { %802 = vmatprep.subr.bf16.mxu1 %v1088_v0 }
  0x80   : > { %783 = vmatpush3.bf16.msra.mxu0 %v782_v16 }
  0x81   : > { %784 = vmatprep.subr.bf16.mxu0 %v1088_v0  ;;  %804 = vmatpush3.bf16.msra.mxu1 %v803_v38 }
  0x82   : > { %805 = vmatprep.subr.bf16.mxu1 %v1088_v0 }
  0x84   : > { %786 = vmatpush3.bf16.msra.mxu0 %v785_v19 }
  0x85   : > { %787 = vmatprep.subr.bf16.mxu0 %v1088_v0  ;;  %807 = vmatpush3.bf16.msra.mxu1 %v806_v41 }
  0x86   : > { %808 = vmatprep.subr.bf16.mxu1 %v1088_v0 }
  0x88   : > { %789 = vmatpush3.bf16.msra.mxu0 %v788_v22 }
  0x89   : > { %790 = vmatprep.subr.bf16.mxu0 %v1088_v0  ;;  %810 = vmatpush3.bf16.msra.mxu1 %v809_v44 }
  0x8a   : > { %811 = vmatprep.subr.bf16.mxu1 %v1088_v0 }
  0x8c   : > { %792 = vmatpush3.bf16.msra.mxu0 %v791_v25 }
  0x8d   : > { %813 = vmatpush3.bf16.msra.mxu1 %v812_v47 }
  0x8e   : > { %814 = vmatprep.subr.bf16.mxu1 %v1088_v0 }
  0x8f   : > { %732 = vmatmul.mubr.f32.vlgmr.msra.gmra.mrb[0].mxu0 %v316_v26 }
  0x91   : > { %816 = vmatpush3.bf16.msra.mxu1 %v815_v50 }
 0x162   : > { %v406_v52 = vpop.f32.mrb[0].mxu0 }
 0x163   : > { %v407_v53 = vadd.f32 %v659_v51, %v406_v52  ;;  %v733_v54 = vpop.f32.mrb[1].mxu0 }
 0x165   : > { %v410_v55 = vmul.f32 -1.702, %v407_v53 }
 0x167   : > { %v411_v56 = vmul.f32 1.442695, %v410_v55 }
 0x169   : > { %905 = vpow2.f32 %v411_v56 }
 0x173   : > { %v906_v57 = vpop.eup %905 }
 0x174   : > { %v413_v58 = vadd.f32 1.0, %v906_v57 }
 0x176   : > { %907 = vrcp.f32 %v413_v58 }
 0x180   : > { %v908_v59 = vpop.eup %907 }
 0x181   : > { %v415_v60 = vmul.f32 %v908_v59, %v407_v53 }
 0x183   : > { %767 = vmatmul.mubr.f32.vlgmr.msra.gmra.mrb[0].mxu1 %v415_v60 }
 0x256   : > { %v499_v62 = vpop.f32.mrb[0].mxu1 }
 0x257   : > { %v516_v63 = vadd.f32 %v660_v61, %v499_v62  ;;  %v768_v0 = vpop.f32.mrb[1].mxu1 }
 0x259   : > { %517 = vst [vmem:[%s306_s9] sm:$0xff] %v516_v63 }
 0x25a   : > { %1008 = shalt.err (!%p1005_p11)
}
 0x25b   : > { %s1009_s13 = scalar_lea.hbm %s1352_s14, 128  ;;  %s1013_s30 = scalar_lea.hbm %s1406_s5, 256 }
 0x25c   : > { %p1010_p0 = scmp.ne.s32.totalorder %s1352_s14, %s1009_s13  ;;  %p1014_p6 = scmp.lt.u32.totalorder %s1352_s14, %s1406_s5 }
 0x25d   : > { %p1015_p7 = scmp.lt.u32.totalorder %s1013_s30, %s1009_s13  ;;  %p1017_p8 = scmp.lt.u32.totalorder %s1009_s13, %s1352_s14 }
 0x25e   : > { %p1011_p4 = pnand %p1010_p0, %p1421_p12 }
 0x25f   : > { %p1016_p2 = por %p1015_p7, %p1014_p6 }
 0x260   : > { %p1012_p13 = pneg %p1011_p4 }
 0x261   : > { %p1018_p1 = por %p1017_p8, %p1016_p2 }
 0x263   : > { %p1019_p10 = pnand %p1018_p1, %p1012_p13 }
 0x265   : > { %1022 = shalt.err (!%p1019_p10)
}
 0x266   : > { %827 = dma.vmem_to_hbm [thread:$0]  (%p1421_p12), %s1354_s11, 128, %s1352_s14, %s519_s10  }
 0x267 PF: > { %s544_s9 = sand.u32 1, %s1061_s18   ;;  %p1422_p3 = scmp.ne.s32.totalorder %s1414_s29, 0 }
 0x268   : > { %p1423_p5 = scmp.ge.s32.totalorder %s1081_s23, 2  ;;  %s545_s15 = scalar_lea.sflag [#allocation5], %s544_s9 }
 0x26a   : > { %p841_p9 = pnand %p1423_p5, %p1422_p3 }
 0x26c   : > { %1056 = dma.done.wait (!%p841_p9), %s545_s15, 128  }
 0x26d   : > { %1058 = vsyncadd (!%p841_p9), %s545_s15, 4294967168  ;;  %s22_s23 = sadd.s32 1, %s1081_s23   ;;  %s1424_s18 = smov %s1065_s19 }
 0x26e   : > { %p19_p11 = scmp.ge.s32.totalorder %s22_s23, 4   ;;  %s1425_s19 = smov %s1069_s20 }
 0x26f   : > { %s1426_s20 = smov %s1264_s6  ;;  %s1427_s21 = smov %s1077_s22 }
 0x270   : > { %s1428_s22 = smov %s1430_s12  ;;  %21 = sbr.rel (!%p19_p11) target bundleno = 7 (0x7), region = 106 }
 0x277   :  { %550 = vsyncpa [#allocation4], 1 }
 0x278   :  { %552 = vsyncpa [#allocation4 + $0x1], 1 }
 0x279   :  { %553 = vsyncpa [#allocation7], 1 }
 0x27a   :  { %554 = vsyncpa [#allocation5], 1 }
 0x27b   :  { %556 = vsyncpa [#allocation5 + $0x1], 1 }

</bundles_post_ra>
